<compile_context>
chip_gen: v5e
topology: v5e:2x2
jax: 0.10.0
libtpu: 0.0.40
codegen_flags: <defaults>
</compile_context>

<pallas_src>
import math

import jax
import jax.numpy as jnp
from jax.experimental import pallas as pl
from jax.experimental.pallas import tpu as pltpu

_INV_SQRT2 = 1.0 / math.sqrt(2.0)


def _round_up(a, b):
    return ((a + b - 1) // b) * b


def _ffn_kernel(x_ref, w1_ref, b1_ref, w2_ref, b2_ref, o_ref, acc_ref):
    # x_ref:  (tm, H)   token tile (constant across the I axis)
    # w1_ref: (H, ti)   streamed slice of W1
    # b1_ref: (1, ti)
    # w2_ref: (ti, H)   streamed slice of W2
    # b2_ref: (1, H)
    # o_ref:  (tm, H)   output tile (resident across the I axis)
    # acc_ref:(tm, H)   f32 accumulator scratch
    j = pl.program_id(1)

    @pl.when(j == 0)
    def _init():
        # Fold the output bias into the accumulator once.
        acc_ref[...] = jnp.broadcast_to(
            b2_ref[...].astype(jnp.float32), acc_ref.shape
        )

    x = x_ref[...]

    # Linear1 partial (MXU) + bias, f32 accumulation.
    h = jnp.dot(x, w1_ref[...], preferred_element_type=jnp.float32)
    h = h + b1_ref[...].astype(jnp.float32)

    # Exact GELU (erf form), matches the PyTorch reference. Elementwise, so
    # tiling along I is exact.
    h = h * 0.5 * (1.0 + jax.lax.erf(h * _INV_SQRT2))

    # Linear2 partial product. Casting the GELU output back to the weight dtype
    # keeps f32 exact and gives bf16 operands the fast MXU path on v6e/v7x.
    acc_ref[...] += jnp.dot(
        h.astype(w2_ref.dtype), w2_ref[...], preferred_element_type=jnp.float32
    )

    @pl.when(j == pl.num_programs(1) - 1)
    def _finalize():
        o_ref[...] = acc_ref[...].astype(o_ref.dtype)


def position_wise_ffn(x, w1, b1, w2, b2, *, tm=256, ti=512):
    """x: (batch, seq, hidden). w1:(H,I) b1:(1,I) w2:(I,H) b2:(1,H)."""
    B, S, H = x.shape
    I = w1.shape[1]
    M = B * S
    x2d = x.reshape(M, H)

    # --- tile sizing (MXU/(8,128)-aligned, clamped to the problem size) ------
    tm_eff = max(8, min(tm, _round_up(M, 8)))          # token tile, mult. of 8
    ti_eff = max(128, min(ti, _round_up(I, 128)))      # interm. tile, mult. of 128
    M_pad = _round_up(M, tm_eff)
    I_pad = _round_up(I, ti_eff)

    # --- zero-pad so every block is full-shape (lane-dense stores, no ragged
    #     tail MXU ops).  Zero-padded I columns contribute exactly 0:
    #     gelu(0 + 0) = 0, and 0 @ W2_pad = 0. -----------------------------------
    if M_pad != M:
        x2d = jnp.pad(x2d, ((0, M_pad - M), (0, 0)))
    if I_pad != I:
        w1 = jnp.pad(w1, ((0, 0), (0, I_pad - I)))
        b1 = jnp.pad(b1, ((0, 0), (0, I_pad - I)))
        w2 = jnp.pad(w2, ((0, I_pad - I), (0, 0)))

    grid_m = M_pad // tm_eff
    grid_i = I_pad // ti_eff
    grid = (grid_m, grid_i)

    # --- explicit VMEM budget from the actual tile footprint ------------------
    bpe = jnp.dtype(x.dtype).itemsize
    tile_bytes = (
        tm_eff * H          # x tile
        + H * ti_eff        # w1 tile
        + 8 * ti_eff        # b1 tile (padded to 8 sublanes)
        + ti_eff * H        # w2 tile
        + 8 * H             # b2 tile
        + tm_eff * H        # out tile
    ) * bpe
    vmem_bytes = 2 * tile_bytes            # double-buffered pipeline
    vmem_bytes += tm_eff * H * 4           # f32 accumulator scratch
    vmem_bytes += 2 * tm_eff * ti_eff * 4  # f32 intermediate h (+ slack)
    vmem_limit = int(min(max(2 * vmem_bytes, 32 * 1024 * 1024),
                         64 * 1024 * 1024))   # stay within v7x's 64 MiB/TC

    cost = pl.CostEstimate(
        flops=4 * M_pad * H * I_pad,                      # two matmuls
        transcendentals=M_pad * I_pad,                    # erf
        bytes_accessed=int(
            (x2d.size * grid_i
             + (w1.size + b1.size + w2.size) * grid_m
             + b2.size
             + M_pad * H) * bpe
        ),
    )

    out2d = pl.pallas_call(
        _ffn_kernel,
        out_shape=jax.ShapeDtypeStruct((M_pad, H), x.dtype),
        grid_spec=pltpu.PrefetchScalarGridSpec(
            num_scalar_prefetch=0,
            grid=grid,
            in_specs=[
                pl.BlockSpec((tm_eff, H), lambda i, j: (i, 0)),   # x tile
                pl.BlockSpec((H, ti_eff), lambda i, j: (0, j)),   # W1 slice
                pl.BlockSpec((1, ti_eff), lambda i, j: (0, j)),   # b1 slice
                pl.BlockSpec((ti_eff, H), lambda i, j: (j, 0)),   # W2 slice
                pl.BlockSpec((1, H), lambda i, j: (0, 0)),        # b2
            ],
            out_specs=pl.BlockSpec((tm_eff, H), lambda i, j: (i, 0)),
            scratch_shapes=[pltpu.VMEM((tm_eff, H), jnp.float32)],
        ),
        compiler_params=pltpu.CompilerParams(
            dimension_semantics=("parallel", "arbitrary"),
            vmem_limit_bytes=vmem_limit,
        ),
        cost_estimate=cost,
    )(x2d, w1, b1, w2, b2)

    return out2d[:M].reshape(B, S, H)


def _reference_ffn(x, w1, b1, w2, b2):
    h = jnp.einsum("bsh,hi->bsi", x, w1) + b1[0]
    h = h * 0.5 * (1.0 + jax.lax.erf(h / math.sqrt(2.0)))
    return jnp.einsum("bsi,ih->bsh", h, w2) + b2[0]


if __name__ == "__main__":
    # Small, module-consistent shapes.
    batch, seq = 2, 8
    hidden_size, intermediate_size = 32, 128

    key = jax.random.PRNGKey(0)
    kx, kw1, kb1, kw2, kb2 = jax.random.split(key, 5)

    x = jax.random.normal(kx, (batch, seq, hidden_size), dtype=jnp.float32)

    # Deterministic parameter init (uniform like nn.Linear's default range).
    bound1 = 1.0 / math.sqrt(hidden_size)
    bound2 = 1.0 / math.sqrt(intermediate_size)
    w1 = jax.random.uniform(kw1, (hidden_size, intermediate_size),
                            minval=-bound1, maxval=bound1, dtype=jnp.float32)
    b1 = jax.random.uniform(kb1, (1, intermediate_size),
                            minval=-bound1, maxval=bound1, dtype=jnp.float32)
    w2 = jax.random.uniform(kw2, (intermediate_size, hidden_size),
                            minval=-bound2, maxval=bound2, dtype=jnp.float32)
    b2 = jax.random.uniform(kb2, (1, hidden_size),
                            minval=-bound2, maxval=bound2, dtype=jnp.float32)

    out = position_wise_ffn(x, w1, b1, w2, b2)
    out = jax.block_until_ready(out)

    ref = _reference_ffn(x, w1, b1, w2, b2)
    assert out.shape == (batch, seq, hidden_size)
    assert jnp.allclose(out, ref, atol=1e-5, rtol=1e-5), "mismatch vs reference"

    print("KERNEL_OK")
</pallas_src>

<mosaic_0001>
module attributes {stable_mosaic.version = 11 : i64} {
  func.func @_ffn_kernel(%arg0: i32, %arg1: i32, %arg2: memref<16x32xf32, #tpu.memory_space<vmem>>, %arg3: memref<32x128xf32, #tpu.memory_space<vmem>>, %arg4: memref<1x128xf32, #tpu.memory_space<vmem>>, %arg5: memref<128x32xf32, #tpu.memory_space<vmem>>, %arg6: memref<1x32xf32, #tpu.memory_space<vmem>>, %arg7: memref<16x32xf32, #tpu.memory_space<vmem>>, %arg8: memref<16x32xf32, #tpu.memory_space<vmem>>) attributes {dimension_semantics = [#tpu.dimension_semantics<parallel>, #tpu.dimension_semantics<arbitrary>], iteration_bounds = array<i64: 1, 1>, scalar_prefetch = 0 : i64, scratch_operands = 1 : i64, tpu.core_type = #tpu.core_type<tc>, window_params = [{transform_indices = @transform_0, window_bounds = array<i64: 16, 32>}, {transform_indices = @transform_1, window_bounds = array<i64: 32, 128>}, {transform_indices = @transform_2, window_bounds = array<i64: 1, 128>}, {transform_indices = @transform_3, window_bounds = array<i64: 128, 32>}, {pipeline_mode = #tpu.pipeline_mode<synchronous>, transform_indices = @transform_4, window_bounds = array<i64: 1, 32>}, {transform_indices = @transform_5, window_bounds = array<i64: 16, 32>}]} {
    %c0_i32 = arith.constant 0 : i32
    %0 = arith.cmpi eq, %arg1, %c0_i32 : i32
    %1 = arith.extui %0 : i1 to i32
    %c0_i32_0 = arith.constant 0 : i32
    %2 = arith.cmpi ne, %1, %c0_i32_0 : i32
    scf.if %2 {
      %c0_18 = arith.constant 0 : index
      %c0_19 = arith.constant 0 : index
      %25 = vector.load %arg6[%c0_18, %c0_19] : memref<1x32xf32, #tpu.memory_space<vmem>>, vector<1x32xf32>
      %26 = vector.shape_cast %25 : vector<1x32xf32> to vector<1x32xf32>
      %27 = vector.broadcast %26 : vector<1x32xf32> to vector<16x32xf32>
      %c0_20 = arith.constant 0 : index
      %c0_21 = arith.constant 0 : index
      %28 = vector.load %arg8[%c0_20, %c0_21] : memref<16x32xf32, #tpu.memory_space<vmem>>, vector<16x32xf32>
      tpu.vector_store %arg8[%c0_20, %c0_21], %27 {strides = array<i32>} : memref<16x32xf32, #tpu.memory_space<vmem>>, vector<16x32xf32>,
    } else {
    }
    %c0 = arith.constant 0 : index
    %c0_1 = arith.constant 0 : index
    %3 = vector.load %arg2[%c0, %c0_1] : memref<16x32xf32, #tpu.memory_space<vmem>>, vector<16x32xf32>
    %c0_2 = arith.constant 0 : index
    %c0_3 = arith.constant 0 : index
    %4 = vector.load %arg3[%c0_2, %c0_3] : memref<32x128xf32, #tpu.memory_space<vmem>>, vector<32x128xf32>
    %cst = arith.constant dense<0.000000e+00> : vector<16x128xf32>
    %5 = tpu.matmul %3, %4, %cst {dimension_numbers = #tpu.dot_dimension_numbers<[1], [0], [0], [1], [0, 0, 1, 1], [], []>} : vector<16x32xf32>, vector<32x128xf32>, vector<16x128xf32> -> vector<16x128xf32>
    %c0_4 = arith.constant 0 : index
    %c0_5 = arith.constant 0 : index
    %6 = vector.load %arg4[%c0_4, %c0_5] : memref<1x128xf32, #tpu.memory_space<vmem>>, vector<1x128xf32>
    %7 = vector.broadcast %6 : vector<1x128xf32> to vector<16x128xf32>
    %8 = arith.addf %5, %7 : vector<16x128xf32>
    %cst_6 = arith.constant 5.000000e-01 : f32
    %9 = vector.broadcast %cst_6 : f32 to vector<16x128xf32>
    %10 = arith.mulf %8, %9 : vector<16x128xf32>
    %cst_7 = arith.constant 0.707106769 : f32
    %11 = vector.broadcast %cst_7 : f32 to vector<16x128xf32>
    %12 = arith.mulf %8, %11 : vector<16x128xf32>
    %13 = math.erf %12 : vector<16x128xf32>
    %cst_8 = arith.constant 1.000000e+00 : f32
    %14 = vector.broadcast %cst_8 : f32 to vector<16x128xf32>
    %15 = arith.addf %14, %13 : vector<16x128xf32>
    %16 = arith.mulf %10, %15 : vector<16x128xf32>
    %c0_9 = arith.constant 0 : index
    %c0_10 = arith.constant 0 : index
    %17 = vector.load %arg8[%c0_9, %c0_10] : memref<16x32xf32, #tpu.memory_space<vmem>>, vector<16x32xf32>
    %c0_11 = arith.constant 0 : index
    %c0_12 = arith.constant 0 : index
    %18 = vector.load %arg5[%c0_11, %c0_12] : memref<128x32xf32, #tpu.memory_space<vmem>>, vector<128x32xf32>
    %cst_13 = arith.constant dense<0.000000e+00> : vector<16x32xf32>
    %19 = tpu.matmul %16, %18, %cst_13 {dimension_numbers = #tpu.dot_dimension_numbers<[1], [0], [0], [1], [0, 0, 1, 1], [], []>} : vector<16x128xf32>, vector<128x32xf32>, vector<16x32xf32> -> vector<16x32xf32>
    %20 = arith.addf %17, %19 : vector<16x32xf32>
    %c0_14 = arith.constant 0 : index
    %c0_15 = arith.constant 0 : index
    %21 = vector.load %arg8[%c0_14, %c0_15] : memref<16x32xf32, #tpu.memory_space<vmem>>, vector<16x32xf32>
    tpu.vector_store %arg8[%c0_14, %c0_15], %20 {strides = array<i32>} : memref<16x32xf32, #tpu.memory_space<vmem>>, vector<16x32xf32>,
    %c0_i32_16 = arith.constant 0 : i32
    %22 = arith.cmpi eq, %arg1, %c0_i32_16 : i32
    %23 = arith.extui %22 : i1 to i32
    %c0_i32_17 = arith.constant 0 : i32
    %24 = arith.cmpi ne, %23, %c0_i32_17 : i32
    scf.if %24 {
      %c0_18 = arith.constant 0 : index
      %c0_19 = arith.constant 0 : index
      %25 = vector.load %arg8[%c0_18, %c0_19] : memref<16x32xf32, #tpu.memory_space<vmem>>, vector<16x32xf32>
      %c0_20 = arith.constant 0 : index
      %c0_21 = arith.constant 0 : index
      %26 = vector.load %arg7[%c0_20, %c0_21] : memref<16x32xf32, #tpu.memory_space<vmem>>, vector<16x32xf32>
      tpu.vector_store %arg7[%c0_20, %c0_21], %25 {strides = array<i32>} : memref<16x32xf32, #tpu.memory_space<vmem>>, vector<16x32xf32>,
    } else {
    }
    return
  }
  func.func @transform_0(%arg0: i32, %arg1: i32) -> (i32, i32) {
    %c0_i32 = arith.constant 0 : i32
    %c0_i32_0 = arith.constant 0 : i32
    return %arg0, %c0_i32 : i32, i32
  }
  func.func @transform_1(%arg0: i32, %arg1: i32) -> (i32, i32) {
    %c0_i32 = arith.constant 0 : i32
    %c0_i32_0 = arith.constant 0 : i32
    return %c0_i32, %arg1 : i32, i32
  }
  func.func @transform_2(%arg0: i32, %arg1: i32) -> (i32, i32) {
    %c0_i32 = arith.constant 0 : i32
    %c0_i32_0 = arith.constant 0 : i32
    return %c0_i32, %arg1 : i32, i32
  }
  func.func @transform_3(%arg0: i32, %arg1: i32) -> (i32, i32) {
    %c0_i32 = arith.constant 0 : i32
    %c0_i32_0 = arith.constant 0 : i32
    return %arg1, %c0_i32 : i32, i32
  }
  func.func @transform_4(%arg0: i32, %arg1: i32) -> (i32, i32) {
    %c0_i32 = arith.constant 0 : i32
    %c0_i32_0 = arith.constant 0 : i32
    %c0_i32_1 = arith.constant 0 : i32
    return %c0_i32, %c0_i32_0 : i32, i32
  }
  func.func @transform_5(%arg0: i32, %arg1: i32) -> (i32, i32) {
    %c0_i32 = arith.constant 0 : i32
    %c0_i32_0 = arith.constant 0 : i32
    return %arg0, %c0_i32 : i32, i32
  }
}

</mosaic_0001>

<bundles_post_ra>
// kernel: tpu_custom_call.1
= control target key start
LH: loop header
LB: loop body
LE: loop exit
PB: predicated region body
PF: predicated region fallthrough
CT: control target
= control target key end

     0   :  { %s431_s0 = inlined_call_operand.vmem [shape: f32[16,32], index: 0, kind: input, shape index: {}]   ;;  %s432_s1 = inlined_call_operand.vmem [shape: f32[32,128], index: 1, kind: input, shape index: {}]   ;;  %s433_s2 = inlined_call_operand.vmem [shape: f32[1,128], index: 2, kind: input, shape index: {}]   ;;  %s434_s3 = inlined_call_operand.vmem [shape: f32[128,32], index: 3, kind: input, shape index: {}]   ;;  %s435_s4 = inlined_call_operand.vmem [shape: f32[1,32], index: 4, kind: input, shape index: {}]   ;;  %s436_s5 = inlined_call_operand.hbm [shape: f32[16,32], index: 5, kind: output, shape index: {}]  }
   0x1   :  { %v37_v0 = vld [vmem:[%s432_s1 + $0x18] sm:$0xff]  ;;  %v36_v1 = vld [vmem:[%s432_s1 + $0x10] sm:$0xff]  ;;  %v35_v2 = vld [vmem:[%s432_s1 + $0x8] sm:$0xff] }
   0x2   :  { %61 = vmatpush.msra.mxu0 %v37_v0 }
   0x4   :  { %62 = vmatpush.msra.mxu0 %v36_v1 }
   0x5   :  { %10 = vsyncpa [#allocation4], 0  ;;  %v34_v3 = vld [vmem:[%s432_s1] sm:$0xff]  ;;  %vm29_vm0 = vcmask 261120   ;;  %v33_v5 = vld [vmem:[%s431_s0 + $0x8] sm:$0xff]  ;;  %s218_s13 = sshll.u32 %s436_s5, 4  ;;  %s219_s13 = int_to_ptr.hbm [resolvable:$true] %s218_s13 }
   0x6   :  { %63 = vmatpush.msra.mxu0 %v35_v2  ;;  %v32_v4 = vld [vmem:[%s431_s0] sm:$0xff]  ;;  %v177_v6 = vld [vmem:[%s434_s3 + $0x78] sm:$0xff]  ;;  %v176_v7 = vld [vmem:[%s434_s3 + $0x70] sm:$0xff]  ;;  %s286_s14 = smov 128   ;;  %s287_s15 = smov 8  }
   0x7   :  { %178 = vmatpush.msra.mxu1 %v177_v6  ;;  %234 = vmatpush.msra.mxu2 %v177_v6  ;;  %v175_v8 = vld [vmem:[%s434_s3 + $0x68] sm:$0xff]  ;;  %v174_v9 = vld [vmem:[%s434_s3 + $0x60] sm:$0xff]  ;;  %v173_v11 = vld [vmem:[%s434_s3 + $0x58] sm:$0xff] }
   0x8   :  { %64 = vmatpush.msra.mxu0 %v34_v3  ;;  %v253_v10 = vld [vmem:[%s433_s2] ss:$0 sm:$0xff]  ;;  %v172_v13 = vld [vmem:[%s434_s3 + $0x50] sm:$0xff]  ;;  %v171_v15 = vld [vmem:[%s434_s3 + $0x48] sm:$0xff] }
   0x9   :  { %230 = vmatmul.msk.f32.vlgmr.msra.gmra.mxu0 %vm29_vm0, %v32_v4  ;;  %179 = vmatpush.msra.mxu1 %v176_v7  ;;  %v170_v17 = vld [vmem:[%s434_s3 + $0x40] sm:$0xff]  ;;  %v169_v19 = vld [vmem:[%s434_s3 + $0x38] sm:$0xff]  ;;  %v168_v20 = vld [vmem:[%s434_s3 + $0x30] sm:$0xff] }
   0xa   :  { %235 = vmatpush.msra.mxu2 %v176_v7  ;;  %v167_v23 = vld [vmem:[%s434_s3 + $0x28] sm:$0xff]  ;;  %v166_v27 = vld [vmem:[%s434_s3 + $0x20] sm:$0xff]  ;;  %v165_v30 = vld [vmem:[%s434_s3 + $0x18] sm:$0xff] }
   0xb   :  { %180 = vmatpush.msra.mxu1 %v175_v8  ;;  %v164_v34 = vld [vmem:[%s434_s3 + $0x10] sm:$0xff]  ;;  %v163_v37 = vld [vmem:[%s434_s3 + $0x8] sm:$0xff]  ;;  %v162_v42 = vld [vmem:[%s434_s3] sm:$0xff] }
   0xc   :  { %236 = vmatpush.msra.mxu2 %v175_v8  ;;  %v254_v62 = vld [vmem:[%s435_s4] ss:$0 sm:$0xff]  ;;  %s285_s4 = smov [#allocation3]  }
   0xd   :  { %181 = vmatpush.msra.mxu1 %v174_v9  ;;  %30 = vst.msk [vmem:[#allocation2] sm:$0xff] %vm29_vm0, %v254_v62  ;;  %s216_s10 = sshll.u32 %s285_s4, 4  ;;  %s217_s10 = int_to_ptr.vmem [resolvable:$true] %s216_s10 }
   0xe   :  { %237 = vmatpush.msra.mxu2 %v174_v9  ;;  %31 = vst.msk [vmem:[#allocation2 + $0x8] sm:$0xff] %vm29_vm0, %v254_v62 }
   0xf   :  { %182 = vmatpush.msra.mxu1 %v173_v11 }
  0x10   :  { %238 = vmatpush.msra.mxu2 %v173_v11 }
  0x11   :  { %231 = vmatmul.msk.f32.gmra.mxu0 %vm29_vm0, %v33_v5  ;;  %183 = vmatpush.msra.mxu1 %v172_v13 }
  0x12   :  { %239 = vmatpush.msra.mxu2 %v172_v13 }
  0x13   :  { %184 = vmatpush.msra.mxu1 %v171_v15 }
  0x14   :  { %240 = vmatpush.msra.mxu2 %v171_v15 }
  0x15   :  { %185 = vmatpush.msra.mxu1 %v170_v17 }
  0x16   :  { %241 = vmatpush.msra.mxu2 %v170_v17 }
  0x17   :  { %186 = vmatpush.msra.mxu1 %v169_v19 }
  0x18   :  { %242 = vmatpush.msra.mxu2 %v169_v19 }
  0x19   :  { %187 = vmatpush.msra.mxu1 %v168_v20 }
  0x1a   :  { %243 = vmatpush.msra.mxu2 %v168_v20 }
  0x1b   :  { %188 = vmatpush.msra.mxu1 %v167_v23 }
  0x1c   :  { %244 = vmatpush.msra.mxu2 %v167_v23 }
  0x1d   :  { %189 = vmatpush.msra.mxu1 %v166_v27 }
  0x1e   :  { %245 = vmatpush.msra.mxu2 %v166_v27 }
  0x1f   :  { %190 = vmatpush.msra.mxu1 %v165_v30 }
  0x20   :  { %246 = vmatpush.msra.mxu2 %v165_v30 }
  0x21   :  { %191 = vmatpush.msra.mxu1 %v164_v34 }
  0x22   :  { %247 = vmatpush.msra.mxu2 %v164_v34 }
  0x23   :  { %192 = vmatpush.msra.mxu1 %v163_v37 }
  0x24   :  { %248 = vmatpush.msra.mxu2 %v163_v37 }
  0x25   :  { %193 = vmatpush.msra.mxu1 %v162_v42 }
  0x26   :  { %249 = vmatpush.msra.mxu2 %v162_v42 }
  0x86   :  { %v66_v12 = vpop.f32.mrf.mxu0 }
  0x87   :  { %v359_v14 = vadd.f32 %v253_v10, %v66_v12 }
  0x89   :  { %v365_v16 = vmul.f32 0.70710677, %v359_v14  ;;  %v72_v34 = vmul.f32 0.5, %v359_v14 }
  0x8b   :  { %v76_v18 = vmul.f32 %v365_v16, %v365_v16 }
  0x8d   :  { %v378_v21 = vmin.f32 %v76_v18, 16.0 }
  0x8e   :  { %v69_v22 = vpop.f32.mrf.mxu0 }
  0x8f   :  { %v78_v24 = vmul.f32 2.1237322e-06, %v378_v21  ;;  %v384_v25 = vadd.f32 %v253_v10, %v69_v22  ;;  %v89_v26 = vmul.f32 3.8918573e-05, %v378_v21 }
  0x91   :  { %v79_v28 = vadd.f32 0.00028619796, %v78_v24  ;;  %v391_v29 = vmul.f32 0.70710677, %v384_v25  ;;  %v90_v31 = vadd.f32 0.001143296, %v89_v26 }
  0x92   :  { %v73_v42 = vmul.f32 0.5, %v384_v25 }
  0x93   :  { %v80_v32 = vmul.f32 %v79_v28, %v378_v21  ;;  %v116_v33 = vmul.f32 %v391_v29, %v391_v29  ;;  %v91_v35 = vmul.f32 %v90_v31, %v378_v21 }
  0x95   :  { %v117_v36 = vmin.f32 %v116_v33, 16.0  ;;  %v92_v38 = vadd.f32 0.014752088, %v91_v35  ;;  %v81_v39 = vadd.f32 0.0036580483, %v80_v32 }
  0x97   :  { %v118_v40 = vmul.f32 2.1237322e-06, %v117_v36  ;;  %v129_v41 = vmul.f32 3.8918573e-05, %v117_v36  ;;  %v93_v43 = vmul.f32 %v92_v38, %v378_v21  ;;  %v82_v47 = vmul.f32 %v81_v39, %v378_v21 }
  0x99   :  { %v119_v44 = vadd.f32 0.00028619796, %v118_v40  ;;  %v130_v45 = vadd.f32 0.001143296, %v129_v41  ;;  %v94_v46 = vadd.f32 0.112945676, %v93_v43 }
  0x9a   :  { %v83_v54 = vadd.f32 0.05243302, %v82_v47 }
  0x9b   :  { %v120_v48 = vmul.f32 %v119_v44, %v117_v36  ;;  %v131_v49 = vmul.f32 %v130_v45, %v117_v36  ;;  %v95_v50 = vmul.f32 %v94_v46, %v378_v21  ;;  %v160_v45 = vld [vmem:[#allocation2] sm:$0xff] }
  0x9c   :  { %v84_v60 = vmul.f32 %v83_v54, %v378_v21 }
  0x9d   :  { %v132_v51 = vadd.f32 0.014752088, %v131_v49  ;;  %v121_v52 = vadd.f32 0.0036580483, %v120_v48  ;;  %v96_v53 = vadd.f32 0.4994258, %v95_v50 }
  0x9e   :  { %v85_v1 = vadd.f32 0.18741608, %v84_v60  ;;  %v161_v48 = vld [vmem:[#allocation2 + $0x8] sm:$0xff] }
  0x9f   :  { %v133_v55 = vmul.f32 %v132_v51, %v117_v36  ;;  %v97_v56 = vmul.f32 %v96_v53, %v378_v21  ;;  %v122_v58 = vmul.f32 %v121_v52, %v117_v36 }
  0xa0   :  { %v86_v6 = vmul.f32 %v85_v1, %v378_v21 }
  0xa1   :  { %v134_v57 = vadd.f32 0.112945676, %v133_v55  ;;  %v98_v59 = vadd.f32 1.0, %v97_v56  ;;  %v123_v0 = vadd.f32 0.05243302, %v122_v58 }
  0xa2   :  { %v87_v11 = vadd.f32 1.1283791, %v86_v6 }
  0xa3   :  { %v135_v61 = vmul.f32 %v134_v57, %v117_v36  ;;  %255 = vrcp.f32 %v98_v59  ;;  %v124_v5 = vmul.f32 %v123_v0, %v117_v36  ;;  %v110_v10 = vand.u32 2147483648, %v98_v59 }
  0xa4   :  { %v108_v13 = vand.u32 2147483647, %v98_v59  ;;  %vm104_vm2 = vweird.f32 %v98_v59  ;;  %v88_v22 = vmul.f32 %v87_v11, %v365_v16 }
  0xa5   :  { %v136_v63 = vadd.f32 0.4994258, %v135_v61  ;;  %v125_v9 = vadd.f32 0.18741608, %v124_v5  ;;  %v111_v19 = vor.u32 1.1754944e-38, %v110_v10 }
  0xa6   :  { %vm109_vm4 = vcmp.eq.f32.partialorder %v108_v13, 8.507059e+37 }
  0xa7   :  { %v137_v2 = vmul.f32 %v136_v63, %v117_v36  ;;  %v126_v18 = vmul.f32 %v125_v9, %v117_v36 }
  0xa9   :  { %v138_v3 = vadd.f32 1.0, %v137_v2  ;;  %v256_v4 = vpop.eup %255  ;;  %v127_v28 = vadd.f32 1.1283791, %v126_v18 }
  0xaa   :  { %v100_v7 = vmul.f32 %v256_v4, %v98_v59  ;;  %vm105_vm1 = vweird.f32 %v256_v4 }
  0xab   :  { %257 = vrcp.f32 %v138_v3  ;;  %vm106_vm3 = vmor %vm104_vm2, %vm105_vm1  ;;  %v150_v27 = vand.u32 2147483648, %v138_v3  ;;  %v148_v31 = vand.u32 2147483647, %v138_v3  ;;  %vm144_vm6 = vweird.f32 %v138_v3 }
  0xac   :  { %v101_v8 = vsub.f32 1.0, %v100_v7  ;;  %v128_v16 = vmul.f32 %v127_v28, %v391_v29 }
  0xad   :  { %v151_v36 = vor.u32 1.1754944e-38, %v150_v27  ;;  %vm149_vm8 = vcmp.eq.f32.partialorder %v148_v31, 8.507059e+37 }
  0xae   :  { %v102_v12 = vmul.f32 %v256_v4, %v101_v8 }
  0xb0   :  { %v103_v17 = vadd.f32 %v256_v4, %v102_v12 }
  0xb1   :  { %v258_v15 = vpop.eup %257 }
  0xb2   :  { %v140_v20 = vmul.f32 %v258_v15, %v138_v3  ;;  %v107_v23 = vsel %vm106_vm3, %v256_v4, %v103_v17  ;;  %vm145_vm5 = vweird.f32 %v258_v15 }
  0xb3   :  { %v112_v21 = vsel %vm109_vm4, %v111_v19, %v107_v23  ;;  %vm146_vm7 = vmor %vm144_vm6, %vm145_vm5 }
  0xb4   :  { %v141_v24 = vsub.f32 1.0, %v140_v20  ;;  %v113_v26 = vmul.f32 %v112_v21, %v88_v22 }
  0xb6   :  { %v142_v30 = vmul.f32 %v258_v15, %v141_v24  ;;  %v232_v32 = vclamps-f32 %v113_v26, 1.0 }
  0xb8   :  { %v143_v33 = vadd.f32 %v258_v15, %v142_v30  ;;  %v156_v35 = vadd.f32 1.0, %v232_v32 }
  0xba   :  { %v147_v37 = vsel %vm146_vm7, %v258_v15, %v143_v33  ;;  %v158_v38 = vmul.f32 %v156_v35, %v72_v34 }
  0xbb   :  { %v152_v39 = vsel %vm149_vm8, %v151_v36, %v147_v37 }
  0xbc   :  { %v153_v40 = vmul.f32 %v152_v39, %v128_v16  ;;  %194 = vmatmul.f32.vlgmr.msra.gmra.mxu1 %v158_v38 }
  0xbe   :  { %v233_v41 = vclamps-f32 %v153_v40, 1.0 }
  0xc0   :  { %v157_v43 = vadd.f32 1.0, %v233_v41 }
  0xc2   :  { %v159_v44 = vmul.f32 %v157_v43, %v73_v42 }
  0xc4   :  { %197 = vmatmul.f32.vlgmr.msra.gmra.mxu2 %v159_v44 }
 0x139   :  { %v195_v46 = vpop.f32.mrf.mxu1 }
 0x13a   :  { %v201_v14 = vadd.f32 %v195_v46, %v160_v45 }
 0x13c   :  { %203 = vst.msk [vmem:[#allocation2] sm:$0xff] %vm29_vm0, %v201_v14 }
 0x143   :  { %v208_v47 = vld [vmem:[#allocation2] sm:$0xff] }
 0x144   :  { %210 = vst.msk [vmem:[#allocation3] sm:$0xff] %vm29_vm0, %v208_v47 }
 0x147   :  { %v198_v29 = vpop.f32.mrf.mxu2 }
 0x148   :  { %v202_v49 = vadd.f32 %v198_v29, %v161_v48 }
 0x14a   :  { %204 = vst.msk [vmem:[#allocation2 + $0x8] sm:$0xff] %vm29_vm0, %v202_v49 }
 0x151   :  { %v209_v25 = vld [vmem:[#allocation2 + $0x8] sm:$0xff] }
 0x152   :  { %211 = vst.msk [vmem:[#allocation3 + $0x8] sm:$0xff] %vm29_vm0, %v209_v25 }
 0x153   :  { %224 = dma.vmem_to_hbm [thread:$0]  %s217_s10, 256, %s219_s13, [#allocation4], %s286_s14, %s286_s14, %s287_s15  }
 0x154   :  { %283 = dma.done.wait [#allocation4], 256  }
 0x155   :  { %284 = vsyncadd [#allocation4], 4294967040 }
 0x156   :  { %229 = vsyncpa [#allocation4], 1 }

</bundles_post_ra>
